<compile_context>
chip_gen: v7x
topology: tpu7x:2x2x1
jax: 0.10.0
libtpu: 0.0.40
codegen_flags: <defaults>
</compile_context>

<pallas_src>
import jax
import jax.numpy as jnp
from jax.experimental import pallas as pl
from jax.experimental.pallas import tpu as pltpu


def _quad_ups_kernel(v_ref, wv_ref, w_ref, ww_ref, x_ref, wx_ref, y_ref, wy_ref,
                     ov_ref, ow_ref, ox_ref, oy_ref):
    # Activation refs: (C, T)  with the flattened-spatial tile T on lanes.
    # Weight refs:     (4C, C).
    # Output refs:     (4C, T) -> lane-dense stores (T is a multiple of 128 or full).
    def one(a_ref, wt_ref, o_ref):
        o_ref[...] = jnp.dot(wt_ref[...], a_ref[...],
                             preferred_element_type=jnp.float32).astype(o_ref.dtype)

    one(v_ref, wv_ref, ov_ref)
    one(w_ref, ww_ref, ow_ref)
    one(x_ref, wx_ref, ox_ref)
    one(y_ref, wy_ref, oy_ref)


def _pick_hw_tile(hw, c, itemsize):
    """Largest spatial tile (lane dim) that divides HW, is a multiple of 128, and
    keeps the double-buffered per-step footprint of all 4 branches small enough
    for v7x's 64 MiB VMEM (with headroom)."""
    if hw % 128 != 0:
        return hw                                  # full last dim is always legal
    budget = 12 * 1024 * 1024
    per_col = 2 * 4 * (c + 4 * c) * itemsize       # dbl-buffer x 4 branches x (in+out)
    cap = max(128, min(hw, budget // max(per_col, 1)))
    t = (cap // 128) * 128
    while t >= 128:
        if hw % t == 0:
            return t
        t -= 128
    return hw


def _pixel_shuffle_nchw(p, B, C, H, W):
    # p: (B, 4C, H, W) conv output, channel index = c*4 + i*2 + j (PyTorch order).
    p = p.reshape(B, C, 2, 2, H, W)
    p = jnp.transpose(p, (0, 1, 4, 2, 5, 3))       # (B, C, H, 2, W, 2)
    return p.reshape(B, C, 2 * H, 2 * W)


@jax.jit
def quad_ups(v, w, x, y, wv, ww, wx, wy):
    """v,w,x,y: NCHW (B, C, H, W).  wv..wy: PyTorch conv weights (4C, C, 1, 1)."""
    B, C, H, W = v.shape
    HW = H * W
    C4 = 4 * C
    itemsize = jnp.dtype(v.dtype).itemsize
    T = _pick_hw_tile(HW, C, itemsize)
    n_t = HW // T

    flat = lambda a: a.reshape(B, C, HW)           # free view, no transpose
    mat = lambda wt: wt.reshape(C4, C)             # (4C, C, 1, 1) -> (4C, C), free

    ins = (flat(v), mat(wv), flat(w), mat(ww), flat(x), mat(wx), flat(y), mat(wy))

    act_spec = pl.BlockSpec((pl.Squeezed(), C, T), lambda b, t: (b, 0, t))
    wt_spec = pl.BlockSpec((C4, C), lambda b, t: (0, 0))
    out_spec = pl.BlockSpec((pl.Squeezed(), C4, T), lambda b, t: (b, 0, t))

    out_shape = tuple(jax.ShapeDtypeStruct((B, C4, HW), v.dtype) for _ in range(4))

    cost = pl.CostEstimate(
        flops=4 * 2 * B * HW * C * C4,
        transcendentals=0,
        bytes_accessed=itemsize * (4 * B * C * HW + 4 * C4 * C + 4 * B * C4 * HW),
    )

    conv_outs = pl.pallas_call(
        _quad_ups_kernel,
        out_shape=out_shape,
        grid_spec=pltpu.PrefetchScalarGridSpec(
            num_scalar_prefetch=0,
            grid=(B, n_t),
            in_specs=[act_spec, wt_spec, act_spec, wt_spec,
                      act_spec, wt_spec, act_spec, wt_spec],
            out_specs=[out_spec, out_spec, out_spec, out_spec],
        ),
        compiler_params=pltpu.CompilerParams(
            dimension_semantics=("parallel", "parallel"),
            vmem_limit_bytes=32 * 1024 * 1024,
        ),
        cost_estimate=cost,
    )(*ins)

    ps = lambda p: _pixel_shuffle_nchw(p.reshape(B, C4, H, W), B, C, H, W)
    return tuple(ps(p) for p in conv_outs)


def _ref_branch(x_nchw, wt):
    # Pure-JAX reference: 1x1 conv (NCHW) + PixelShuffle(2), matching PyTorch.
    B, C, H, W = x_nchw.shape
    C4 = wt.shape[0]
    p = jnp.einsum('oc,bchw->bohw', wt.reshape(C4, C), x_nchw)
    p = p.reshape(B, C, 2, 2, H, W)
    p = jnp.transpose(p, (0, 1, 4, 2, 5, 3))
    return p.reshape(B, C, 2 * H, 2 * W)


if __name__ == "__main__":
    B, C, H, W = 2, 4, 16, 16
    C4 = 4 * C
    key = jax.random.PRNGKey(0)
    kv, kw, kx, ky, k1, k2, k3, k4 = jax.random.split(key, 8)

    v = jax.random.normal(kv, (B, C, H, W), jnp.float32)
    w = jax.random.normal(kw, (B, C, H, W), jnp.float32)
    x = jax.random.normal(kx, (B, C, H, W), jnp.float32)
    y = jax.random.normal(ky, (B, C, H, W), jnp.float32)

    # Deterministic synthetic conv weights, shape (4C, C, 1, 1) like nn.Conv2d.
    scale = 1.0 / jnp.sqrt(jnp.float32(C))
    wv = jax.random.normal(k1, (C4, C, 1, 1), jnp.float32) * scale
    ww = jax.random.normal(k2, (C4, C, 1, 1), jnp.float32) * scale
    wx = jax.random.normal(k3, (C4, C, 1, 1), jnp.float32) * scale
    wy = jax.random.normal(k4, (C4, C, 1, 1), jnp.float32) * scale

    outs = quad_ups(v, w, x, y, wv, ww, wx, wy)
    outs = jax.block_until_ready(outs)

    refs = (_ref_branch(v, wv), _ref_branch(w, ww),
            _ref_branch(x, wx), _ref_branch(y, wy))
    for o, r in zip(outs, refs):
        assert o.shape == (B, C, 2 * H, 2 * W)
        assert jnp.allclose(o, r, atol=1e-4, rtol=1e-4)

    print("KERNEL_OK")
</pallas_src>

<mosaic_0001>
module attributes {stable_mosaic.version = 11 : i64} {
  func.func @_quad_ups_kernel(%arg0: i32, %arg1: i32, %arg2: memref<1x4x256xf32, #tpu.memory_space<vmem>>, %arg3: memref<16x4xf32, #tpu.memory_space<vmem>>, %arg4: memref<1x4x256xf32, #tpu.memory_space<vmem>>, %arg5: memref<16x4xf32, #tpu.memory_space<vmem>>, %arg6: memref<1x4x256xf32, #tpu.memory_space<vmem>>, %arg7: memref<16x4xf32, #tpu.memory_space<vmem>>, %arg8: memref<1x4x256xf32, #tpu.memory_space<vmem>>, %arg9: memref<16x4xf32, #tpu.memory_space<vmem>>, %arg10: memref<1x16x256xf32, #tpu.memory_space<vmem>>, %arg11: memref<1x16x256xf32, #tpu.memory_space<vmem>>, %arg12: memref<1x16x256xf32, #tpu.memory_space<vmem>>, %arg13: memref<1x16x256xf32, #tpu.memory_space<vmem>>) attributes {dimension_semantics = [#tpu.dimension_semantics<parallel>, #tpu.dimension_semantics<parallel>], iteration_bounds = array<i64: 2, 1>, scalar_prefetch = 0 : i64, scratch_operands = 0 : i64, tpu.core_type = #tpu.core_type<tc>, window_params = [{transform_indices = @transform_0, window_bounds = array<i64: 1, 4, 256>}, {pipeline_mode = #tpu.pipeline_mode<synchronous>, transform_indices = @transform_1, window_bounds = array<i64: 16, 4>}, {transform_indices = @transform_2, window_bounds = array<i64: 1, 4, 256>}, {pipeline_mode = #tpu.pipeline_mode<synchronous>, transform_indices = @transform_3, window_bounds = array<i64: 16, 4>}, {transform_indices = @transform_4, window_bounds = array<i64: 1, 4, 256>}, {pipeline_mode = #tpu.pipeline_mode<synchronous>, transform_indices = @transform_5, window_bounds = array<i64: 16, 4>}, {transform_indices = @transform_6, window_bounds = array<i64: 1, 4, 256>}, {pipeline_mode = #tpu.pipeline_mode<synchronous>, transform_indices = @transform_7, window_bounds = array<i64: 16, 4>}, {transform_indices = @transform_8, window_bounds = array<i64: 1, 16, 256>}, {transform_indices = @transform_9, window_bounds = array<i64: 1, 16, 256>}, {transform_indices = @transform_10, window_bounds = array<i64: 1, 16, 256>}, {transform_indices = @transform_11, window_bounds = array<i64: 1, 16, 256>}]} {
    %c0 = arith.constant 0 : index
    %c0_0 = arith.constant 0 : index
    %0 = vector.load %arg3[%c0, %c0_0] : memref<16x4xf32, #tpu.memory_space<vmem>>, vector<16x4xf32>
    %c0_1 = arith.constant 0 : index
    %c0_2 = arith.constant 0 : index
    %c0_3 = arith.constant 0 : index
    %1 = vector.load %arg2[%c0_1, %c0_2, %c0_3] : memref<1x4x256xf32, #tpu.memory_space<vmem>>, vector<1x4x256xf32>
    %2 = vector.shape_cast %1 : vector<1x4x256xf32> to vector<4x256xf32>
    %cst = arith.constant dense<0.000000e+00> : vector<16x256xf32>
    %3 = tpu.matmul %0, %2, %cst {dimension_numbers = #tpu.dot_dimension_numbers<[1], [0], [0], [1], [0, 0, 1, 1], [], []>} : vector<16x4xf32>, vector<4x256xf32>, vector<16x256xf32> -> vector<16x256xf32>
    %c0_4 = arith.constant 0 : index
    %c0_5 = arith.constant 0 : index
    %c0_6 = arith.constant 0 : index
    %4 = vector.load %arg10[%c0_4, %c0_5, %c0_6] : memref<1x16x256xf32, #tpu.memory_space<vmem>>, vector<1x16x256xf32>
    %5 = vector.shape_cast %4 : vector<1x16x256xf32> to vector<16x256xf32>
    %6 = vector.shape_cast %3 : vector<16x256xf32> to vector<1x16x256xf32>
    tpu.vector_store %arg10[%c0_4, %c0_5, %c0_6], %6 {strides = array<i32>} : memref<1x16x256xf32, #tpu.memory_space<vmem>>, vector<1x16x256xf32>,
    %c0_7 = arith.constant 0 : index
    %c0_8 = arith.constant 0 : index
    %7 = vector.load %arg5[%c0_7, %c0_8] : memref<16x4xf32, #tpu.memory_space<vmem>>, vector<16x4xf32>
    %c0_9 = arith.constant 0 : index
    %c0_10 = arith.constant 0 : index
    %c0_11 = arith.constant 0 : index
    %8 = vector.load %arg4[%c0_9, %c0_10, %c0_11] : memref<1x4x256xf32, #tpu.memory_space<vmem>>, vector<1x4x256xf32>
    %9 = vector.shape_cast %8 : vector<1x4x256xf32> to vector<4x256xf32>
    %cst_12 = arith.constant dense<0.000000e+00> : vector<16x256xf32>
    %10 = tpu.matmul %7, %9, %cst_12 {dimension_numbers = #tpu.dot_dimension_numbers<[1], [0], [0], [1], [0, 0, 1, 1], [], []>} : vector<16x4xf32>, vector<4x256xf32>, vector<16x256xf32> -> vector<16x256xf32>
    %c0_13 = arith.constant 0 : index
    %c0_14 = arith.constant 0 : index
    %c0_15 = arith.constant 0 : index
    %11 = vector.load %arg11[%c0_13, %c0_14, %c0_15] : memref<1x16x256xf32, #tpu.memory_space<vmem>>, vector<1x16x256xf32>
    %12 = vector.shape_cast %11 : vector<1x16x256xf32> to vector<16x256xf32>
    %13 = vector.shape_cast %10 : vector<16x256xf32> to vector<1x16x256xf32>
    tpu.vector_store %arg11[%c0_13, %c0_14, %c0_15], %13 {strides = array<i32>} : memref<1x16x256xf32, #tpu.memory_space<vmem>>, vector<1x16x256xf32>,
    %c0_16 = arith.constant 0 : index
    %c0_17 = arith.constant 0 : index
    %14 = vector.load %arg7[%c0_16, %c0_17] : memref<16x4xf32, #tpu.memory_space<vmem>>, vector<16x4xf32>
    %c0_18 = arith.constant 0 : index
    %c0_19 = arith.constant 0 : index
    %c0_20 = arith.constant 0 : index
    %15 = vector.load %arg6[%c0_18, %c0_19, %c0_20] : memref<1x4x256xf32, #tpu.memory_space<vmem>>, vector<1x4x256xf32>
    %16 = vector.shape_cast %15 : vector<1x4x256xf32> to vector<4x256xf32>
    %cst_21 = arith.constant dense<0.000000e+00> : vector<16x256xf32>
    %17 = tpu.matmul %14, %16, %cst_21 {dimension_numbers = #tpu.dot_dimension_numbers<[1], [0], [0], [1], [0, 0, 1, 1], [], []>} : vector<16x4xf32>, vector<4x256xf32>, vector<16x256xf32> -> vector<16x256xf32>
    %c0_22 = arith.constant 0 : index
    %c0_23 = arith.constant 0 : index
    %c0_24 = arith.constant 0 : index
    %18 = vector.load %arg12[%c0_22, %c0_23, %c0_24] : memref<1x16x256xf32, #tpu.memory_space<vmem>>, vector<1x16x256xf32>
    %19 = vector.shape_cast %18 : vector<1x16x256xf32> to vector<16x256xf32>
    %20 = vector.shape_cast %17 : vector<16x256xf32> to vector<1x16x256xf32>
    tpu.vector_store %arg12[%c0_22, %c0_23, %c0_24], %20 {strides = array<i32>} : memref<1x16x256xf32, #tpu.memory_space<vmem>>, vector<1x16x256xf32>,
    %c0_25 = arith.constant 0 : index
    %c0_26 = arith.constant 0 : index
    %21 = vector.load %arg9[%c0_25, %c0_26] : memref<16x4xf32, #tpu.memory_space<vmem>>, vector<16x4xf32>
    %c0_27 = arith.constant 0 : index
    %c0_28 = arith.constant 0 : index
    %c0_29 = arith.constant 0 : index
    %22 = vector.load %arg8[%c0_27, %c0_28, %c0_29] : memref<1x4x256xf32, #tpu.memory_space<vmem>>, vector<1x4x256xf32>
    %23 = vector.shape_cast %22 : vector<1x4x256xf32> to vector<4x256xf32>
    %cst_30 = arith.constant dense<0.000000e+00> : vector<16x256xf32>
    %24 = tpu.matmul %21, %23, %cst_30 {dimension_numbers = #tpu.dot_dimension_numbers<[1], [0], [0], [1], [0, 0, 1, 1], [], []>} : vector<16x4xf32>, vector<4x256xf32>, vector<16x256xf32> -> vector<16x256xf32>
    %c0_31 = arith.constant 0 : index
    %c0_32 = arith.constant 0 : index
    %c0_33 = arith.constant 0 : index
    %25 = vector.load %arg13[%c0_31, %c0_32, %c0_33] : memref<1x16x256xf32, #tpu.memory_space<vmem>>, vector<1x16x256xf32>
    %26 = vector.shape_cast %25 : vector<1x16x256xf32> to vector<16x256xf32>
    %27 = vector.shape_cast %24 : vector<16x256xf32> to vector<1x16x256xf32>
    tpu.vector_store %arg13[%c0_31, %c0_32, %c0_33], %27 {strides = array<i32>} : memref<1x16x256xf32, #tpu.memory_space<vmem>>, vector<1x16x256xf32>,
    return
  }
  func.func @transform_0(%arg0: i32, %arg1: i32) -> (i32, i32, i32) {
    %c0_i32 = arith.constant 0 : i32
    %c0_i32_0 = arith.constant 0 : i32
    return %arg0, %c0_i32, %arg1 : i32, i32, i32
  }
  func.func @transform_1(%arg0: i32, %arg1: i32) -> (i32, i32) {
    %c0_i32 = arith.constant 0 : i32
    %c0_i32_0 = arith.constant 0 : i32
    %c0_i32_1 = arith.constant 0 : i32
    return %c0_i32, %c0_i32_0 : i32, i32
  }
  func.func @transform_2(%arg0: i32, %arg1: i32) -> (i32, i32, i32) {
    %c0_i32 = arith.constant 0 : i32
    %c0_i32_0 = arith.constant 0 : i32
    return %arg0, %c0_i32, %arg1 : i32, i32, i32
  }
  func.func @transform_3(%arg0: i32, %arg1: i32) -> (i32, i32) {
    %c0_i32 = arith.constant 0 : i32
    %c0_i32_0 = arith.constant 0 : i32
    %c0_i32_1 = arith.constant 0 : i32
    return %c0_i32, %c0_i32_0 : i32, i32
  }
  func.func @transform_4(%arg0: i32, %arg1: i32) -> (i32, i32, i32) {
    %c0_i32 = arith.constant 0 : i32
    %c0_i32_0 = arith.constant 0 : i32
    return %arg0, %c0_i32, %arg1 : i32, i32, i32
  }
  func.func @transform_5(%arg0: i32, %arg1: i32) -> (i32, i32) {
    %c0_i32 = arith.constant 0 : i32
    %c0_i32_0 = arith.constant 0 : i32
    %c0_i32_1 = arith.constant 0 : i32
    return %c0_i32, %c0_i32_0 : i32, i32
  }
  func.func @transform_6(%arg0: i32, %arg1: i32) -> (i32, i32, i32) {
    %c0_i32 = arith.constant 0 : i32
    %c0_i32_0 = arith.constant 0 : i32
    return %arg0, %c0_i32, %arg1 : i32, i32, i32
  }
  func.func @transform_7(%arg0: i32, %arg1: i32) -> (i32, i32) {
    %c0_i32 = arith.constant 0 : i32
    %c0_i32_0 = arith.constant 0 : i32
    %c0_i32_1 = arith.constant 0 : i32
    return %c0_i32, %c0_i32_0 : i32, i32
  }
  func.func @transform_8(%arg0: i32, %arg1: i32) -> (i32, i32, i32) {
    %c0_i32 = arith.constant 0 : i32
    %c0_i32_0 = arith.constant 0 : i32
    return %arg0, %c0_i32, %arg1 : i32, i32, i32
  }
  func.func @transform_9(%arg0: i32, %arg1: i32) -> (i32, i32, i32) {
    %c0_i32 = arith.constant 0 : i32
    %c0_i32_0 = arith.constant 0 : i32
    return %arg0, %c0_i32, %arg1 : i32, i32, i32
  }
  func.func @transform_10(%arg0: i32, %arg1: i32) -> (i32, i32, i32) {
    %c0_i32 = arith.constant 0 : i32
    %c0_i32_0 = arith.constant 0 : i32
    return %arg0, %c0_i32, %arg1 : i32, i32, i32
  }
  func.func @transform_11(%arg0: i32, %arg1: i32) -> (i32, i32, i32) {
    %c0_i32 = arith.constant 0 : i32
    %c0_i32_0 = arith.constant 0 : i32
    return %arg0, %c0_i32, %arg1 : i32, i32, i32
  }
}

</mosaic_0001>

<bundles_post_ra>
// kernel: quad_ups.1
= control target key start
LH: loop header
LB: loop body
LE: loop exit
PB: predicated region body
PF: predicated region fallthrough
CT: control target
= control target key end

     0   :  { %s1442_s17 = smov 0   ;;  %s1444_s18 = smov 0   ;;  %s1537_s0 = inlined_call_operand.vmem [shape: f32[2,4,256], index: 0, kind: input, shape index: {}]   ;;  %s1538_s1 = inlined_call_operand.vmem [shape: f32[16,4], index: 1, kind: input, shape index: {}]   ;;  %s1539_s2 = inlined_call_operand.vmem [shape: f32[2,4,256], index: 2, kind: input, shape index: {}]   ;;  %s1540_s3 = inlined_call_operand.vmem [shape: f32[16,4], index: 3, kind: input, shape index: {}]   ;;  %s1541_s4 = inlined_call_operand.vmem [shape: f32[2,4,256], index: 4, kind: input, shape index: {}]   ;;  %s1542_s5 = inlined_call_operand.vmem [shape: f32[16,4], index: 5, kind: input, shape index: {}]   ;;  %s1543_s6 = inlined_call_operand.vmem [shape: f32[2,4,256], index: 6, kind: input, shape index: {}]   ;;  %s1544_s7 = inlined_call_operand.vmem [shape: f32[16,4], index: 7, kind: input, shape index: {}]   ;;  %s1545_s8 = inlined_call_operand.vmem [shape: f32[2,16,256], index: 8, kind: output, shape index: {0}]   ;;  %s1546_s9 = inlined_call_operand.vmem [shape: f32[2,16,256], index: 9, kind: output, shape index: {1}]   ;;  %s1547_s10 = inlined_call_operand.vmem [shape: f32[2,16,256], index: 10, kind: output, shape index: {2}]   ;;  %s1548_s11 = inlined_call_operand.vmem [shape: f32[2,16,256], index: 11, kind: output, shape index: {3}]  }
   0x1   :  { %s1446_s19 = smov 0  }
   0x2 LB: > { %s34_s20 = sadd.s32 1, %s1375_s18  ;;  %p1285_p0 = scmp.ge.s32.totalorder %s1379_s19, 1  ;;  %s1379_s19 = sphi %s1446_s19, %s22_s19   ;;  %s1375_s18 = sphi %s1444_s18, %s1550_s18   ;;  %s1371_s17 = sphi %s1442_s17, %s1549_s17  }
   0x3   : > { %p36_p1 = scmp.ge.s32.totalorder %s34_s20, 2  ;;  %p422_p2 = scmp.lt.s32.totalorder %s1379_s19, 3 }
   0x5   : > { %s1552_s20 = smov (%p36_p1, %s34_s20), 0  ;;  %p423_p3 = pnand %p1285_p0, %p422_p2 }
   0x6   : > { %p525_p4 = scmp.lt.s32.totalorder (!%p423_p3), %s1371_s17, 1  ;;  %v1381_v0 = vmov (!%p423_p3), 0.0   ;;  %vm616_vm0 = vcmask (!%p423_p3), 1043456   ;;  %v604_v7 = vld [vmem:[%s1538_s1] sm:$0xff] (!%p423_p3)  ;;  %vm609_vm1 = vcmask (!%p423_p3), 31744   ;;  %v605_v11 = vld [vmem:[%s1538_s1 + $0x8] sm:$0xff] (!%p423_p3) }
   0x7   : > { %426 = sbr.rel (%p423_p3) target bundleno = 249 (0xf9), region = 52  ;;  %685 = vmatprep.mubr.f32.mxu0 (!%p423_p3), %v1381_v0  ;;  %781 = vmatprep.mubr.f32.mxu1 (!%p423_p3), %v1381_v0  ;;  %v702_v8 = vld [vmem:[%s1540_s3] sm:$0xff] (!%p423_p3)  ;;  %v703_v12 = vld [vmem:[%s1540_s3 + $0x8] sm:$0xff] (!%p423_p3) }
   0x8   : > { %v798_v13 = vld [vmem:[%s1542_s5] sm:$0xff] (!%p423_p3)  ;;  %v799_v15 = vld [vmem:[%s1542_s5 + $0x8] sm:$0xff] (!%p423_p3) }
   0x9   : > { %v894_v14 = vld [vmem:[%s1544_s7] sm:$0xff] (!%p423_p3)  ;;  %v895_v16 = vld [vmem:[%s1544_s7 + $0x8] sm:$0xff] (!%p423_p3) }
   0xe   : > { %s1554_s17 = smov (!%p525_p4, %s1371_s17), 1 }
   0xf   : > { %s1320_s21 = sshll.u32 %s1554_s17, 3  ;;  %s1324_s16 = sshll.u32 %s1554_s17, 5 }
  0x10   : > { %s532_s24 = scalar_lea.vmem %s1537_s0, %s1320_s21  ;;  %s542_s27 = scalar_lea.vmem %s1539_s2, %s1320_s21 }
  0x11   : > { %v606_v1 = vld [vmem:[%s532_s24] sm:$0xff]  ;;  %s552_s30 = scalar_lea.vmem %s1541_s4, %s1320_s21  ;;  %s562_s14 = scalar_lea.vmem %s1543_s6, %s1320_s21 }
  0x12   : > { %v704_v2 = vld [vmem:[%s542_s27] sm:$0xff]  ;;  %v608_v3 = vcombine.high %v606_v1, %v606_v1  ;;  %s572_s21 = scalar_lea.vmem %s1545_s8, %s1324_s16  ;;  %s582_s26 = scalar_lea.vmem %s1546_s9, %s1324_s16 }
  0x13   : > { %v706_v4 = vcombine.high %v704_v2, %v704_v2  ;;  %v800_v5 = vld [vmem:[%s552_s30] sm:$0xff]  ;;  %s592_s28 = scalar_lea.vmem %s1547_s10, %s1324_s16  ;;  %s602_s12 = scalar_lea.vmem %s1548_s11, %s1324_s16 }
  0x14   : > { %v896_v6 = vld [vmem:[%s562_s14] sm:$0xff]  ;;  %v802_v9 = vcombine.high %v800_v5, %v800_v5  ;;  %1302 = vmatprep.subr.msk.mxu0 %vm616_vm0, %v608_v3 }
  0x15   : > { %v898_v10 = vcombine.high %v896_v6, %v896_v6  ;;  %1306 = vmatprep.subr.msk.mxu1 %vm616_vm0, %v706_v4  ;;  %1303 = vmatpush1.msk.msra.mxu0 %vm616_vm0, %v606_v1 }
  0x16   : > { %1307 = vmatpush1.msk.msra.mxu1 %vm616_vm0, %v704_v2  ;;  %1304 = vmatmul.mubr.msk.f32.vlgmr.msra.gmra.mrb[0].mxu0 %vm609_vm1, %v604_v7 }
  0x17   : > { %1308 = vmatmul.mubr.msk.f32.vlgmr.msra.gmra.mrb[0].mxu1 %vm609_vm1, %v702_v8  ;;  %1310 = vmatprep.subr.msk.mxu0 %vm616_vm0, %v802_v9 }
  0x18   : > { %1314 = vmatprep.subr.msk.mxu1 %vm616_vm0, %v898_v10  ;;  %1311 = vmatpush1.msk.msra.mxu0 %vm616_vm0, %v800_v5 }
  0x19   : > { %1315 = vmatpush1.msk.msra.mxu1 %vm616_vm0, %v896_v6  ;;  %691 = vmatprep.mubr.f32.mxu0 %v1381_v0 }
  0x1a   : > { %787 = vmatprep.mubr.f32.mxu1 %v1381_v0  ;;  %1305 = vmatmul.mubr.msk.f32.gmra.mrb[2].mxu0 %vm609_vm1, %v605_v11 }
  0x1b   : > { %1309 = vmatmul.mubr.msk.f32.gmra.mrb[2].mxu1 %vm609_vm1, %v703_v12  ;;  %877 = vmatprep.mubr.f32.mxu0 %v1381_v0 }
  0x1c   : > { %973 = vmatprep.mubr.f32.mxu1 %v1381_v0 }
  0x1e   : > { %1312 = vmatmul.mubr.msk.f32.vlgmr.msra.gmra.mrb[4].mxu0 %vm609_vm1, %v798_v13 }
  0x1f   : > { %1316 = vmatmul.mubr.msk.f32.vlgmr.msra.gmra.mrb[4].mxu1 %vm609_vm1, %v894_v14  ;;  %883 = vmatprep.mubr.f32.mxu0 %v1381_v0 }
  0x20   : > { %979 = vmatprep.mubr.f32.mxu1 %v1381_v0 }
  0x22   : > { %1313 = vmatmul.mubr.msk.f32.gmra.mrb[6].mxu0 %vm609_vm1, %v799_v15 }
  0x23   : > { %1317 = vmatmul.mubr.msk.f32.gmra.mrb[6].mxu1 %vm609_vm1, %v895_v16 }
  0xe9   : > { %v687_v17 = vpop.f32.mrb[0].mxu0 }
  0xea   : > { %v783_v18 = vpop.f32.mrb[0].mxu1  ;;  %698 = vst [vmem:[%s572_s21] sm:$0xff] %v687_v17  ;;  %v689_v19 = vpop.f32.mrb[1].mxu0 }
  0xeb   : > { %794 = vst [vmem:[%s582_s26] sm:$0xff] %v783_v18  ;;  %v785_v20 = vpop.f32.mrb[1].mxu1  ;;  %699 = vst [vmem:[%s572_s21 + $0x8] sm:$0xff] %v689_v19 }
  0xec   : > { %795 = vst [vmem:[%s582_s26 + $0x8] sm:$0xff] %v785_v20 }
  0xed   : > { %v693_v21 = vpop.f32.mrb[2].mxu0 }
  0xee   : > { %v789_v22 = vpop.f32.mrb[2].mxu1  ;;  %700 = vst [vmem:[%s572_s21 + $0x10] sm:$0xff] %v693_v21  ;;  %v695_v23 = vpop.f32.mrb[3].mxu0 }
  0xef   : > { %796 = vst [vmem:[%s582_s26 + $0x10] sm:$0xff] %v789_v22  ;;  %v791_v24 = vpop.f32.mrb[3].mxu1  ;;  %701 = vst [vmem:[%s572_s21 + $0x18] sm:$0xff] %v695_v23 }
  0xf0   : > { %797 = vst [vmem:[%s582_s26 + $0x18] sm:$0xff] %v791_v24 }
  0xf1   : > { %v879_v25 = vpop.f32.mrb[4].mxu0 }
  0xf2   : > { %v975_v26 = vpop.f32.mrb[4].mxu1  ;;  %890 = vst [vmem:[%s592_s28] sm:$0xff] %v879_v25  ;;  %v881_v27 = vpop.f32.mrb[5].mxu0 }
  0xf3   : > { %986 = vst [vmem:[%s602_s12] sm:$0xff] %v975_v26  ;;  %v977_v28 = vpop.f32.mrb[5].mxu1  ;;  %891 = vst [vmem:[%s592_s28 + $0x8] sm:$0xff] %v881_v27 }
  0xf4   : > { %987 = vst [vmem:[%s602_s12 + $0x8] sm:$0xff] %v977_v28 }
  0xf5   : > { %v885_v29 = vpop.f32.mrb[6].mxu0 }
  0xf6   : > { %v981_v30 = vpop.f32.mrb[6].mxu1  ;;  %892 = vst [vmem:[%s592_s28 + $0x10] sm:$0xff] %v885_v29  ;;  %v887_v31 = vpop.f32.mrb[7].mxu0 }
  0xf7   : > { %988 = vst [vmem:[%s602_s12 + $0x10] sm:$0xff] %v981_v30  ;;  %v983_v32 = vpop.f32.mrb[7].mxu1  ;;  %893 = vst [vmem:[%s592_s28 + $0x18] sm:$0xff] %v887_v31 }
  0xf8   : > { %989 = vst [vmem:[%s602_s12 + $0x18] sm:$0xff] %v983_v32 }
  0xf9 PF: > { %s22_s19 = sadd.s32 1, %s1379_s19   ;;  %s1549_s17 = smov %s1375_s18 }
  0xfa   : > { %p19_p5 = scmp.ge.s32.totalorder %s22_s19, 4   ;;  %s1550_s18 = smov %s1552_s20 }
  0xfc   :  { %21 = sbr.rel (!%p19_p5) target bundleno = 2 (0x2), region = 127 }

</bundles_post_ra>
